<compile_context>
chip_gen: v7x
topology: tpu7x:2x2x1
jax: 0.10.0
libtpu: 0.0.40
codegen_flags: <defaults>
</compile_context>

<pallas_src>
import functools

import jax
import jax.numpy as jnp
from jax.experimental import pallas as pl
from jax.experimental.pallas import tpu as pltpu


def _round_up(x, m):
    return ((x + m - 1) // m) * m


def ntn_kernel(c_ref, e_ref, w3_ref, ws_ref, b_ref, out_ref, *, k_dim, e_dim):
    tn = c_ref.shape[0]                       # batch tile width (static)

    # Stage 1 -- fused bilinear, one MXU matmul with a lane-dense output:
    #   t[k*E + j, n] = sum_i W[k, i, j] * c[n, i]
    # (contraction on the trailing dims of both operands; Mosaic handles the
    #  operand orientation in VMEM -- no wrapper-side HBM transpose needed).
    t = jax.lax.dot_general(
        w3_ref[...], c_ref[...],
        dimension_numbers=(((1,), (1,)), ((), ())),
        preferred_element_type=jnp.float32)                         # [K*E, TN] f32

    # e^T computed in VMEM (cast first so the transpose is plain f32 XLU work).
    et = e_ref[...].astype(jnp.float32).T                           # [E, TN]

    # Stage 2 -- per-slice contraction with e via reshape + broadcast +
    # sublane reduce (no tiled e copy, no selector matmul, no extra MXU push):
    #   v[k, n] = sum_j t[k*E + j, n] * e[n, j]
    v = jnp.sum(t.reshape(k_dim, e_dim, tn) * et[None, :, :], axis=1)  # [K, TN]

    # Scoring head: ReLU -> weighted sublane reduce (VPU/XLU; MXU stays free)
    # -> bias (SMEM scalar) -> sigmoid (exp on the EUP).
    v = jnp.maximum(v, 0.0)
    s = jnp.sum(v * ws_ref[...], axis=0, keepdims=True) + b_ref[0, 0]  # [1, TN]
    out_ref[...] = (1.0 / (1.0 + jnp.exp(-s))).astype(out_ref.dtype)


def ntn_forward(c, e, W, w_score, b_score, *,
                tile_n=2048, compute_dtype=jnp.bfloat16):
    N, C = c.shape
    _, E = e.shape
    K = W.shape[0]

    # ---- One-time parameter layout (tiny, pure layout; not per-step work) ----
    # W3[k*E + j, i] = W[k, i, j]  ->  fused bilinear weight [K*E, C].
    W3 = jnp.transpose(W, (0, 2, 1)).reshape(K * E, C).astype(compute_dtype)
    ws = jnp.asarray(w_score, jnp.float32).reshape(K, 1)
    b = jnp.asarray(b_score, jnp.float32).reshape(1, 1)

    # Operands on the wire in compute_dtype (bf16 halves HBM bytes of the
    # memory-bound path; f32 accumulation is kept inside the kernel).
    c = c.astype(compute_dtype)
    e = e.astype(compute_dtype)

    n_pad128 = _round_up(N, 128)
    if n_pad128 <= tile_n:
        # Small batch: a single lane-dense block.  Pad the batch dim to a
        # multiple of 128 only (bounded, tiny copy -- at most tile_n rows).
        tile = n_pad128
        if n_pad128 != N:
            c = jnp.pad(c, ((0, n_pad128 - N), (0, 0)))
            e = jnp.pad(e, ((0, n_pad128 - N), (0, 0)))
        num_tiles = 1
    else:
        # Large batch: big tiles and NO wrapper-side copy/pad/transpose of the
        # activations.  The final grid block may be partial; Pallas clamps the
        # DMA to the array bounds and any garbage lanes only affect output
        # columns >= N, which are sliced off below.  Grid steps >= 2 here also
        # give v7x's two TensorCores independent batch tiles ("parallel").
        tile = tile_n
        num_tiles = pl.cdiv(N, tile)
    n_out = num_tiles * tile

    out_row = pl.pallas_call(
        functools.partial(ntn_kernel, k_dim=K, e_dim=E),
        out_shape=jax.ShapeDtypeStruct((1, n_out), jnp.float32),
        grid_spec=pltpu.PrefetchScalarGridSpec(
            num_scalar_prefetch=0,
            grid=(num_tiles,),
            in_specs=[
                pl.BlockSpec((tile, C), lambda i: (i, 0)),       # c tile, natural layout
                pl.BlockSpec((tile, E), lambda i: (i, 0)),       # e tile, natural layout
                pl.BlockSpec((K * E, C), lambda i: (0, 0)),      # fused bilinear weight (resident)
                pl.BlockSpec((K, 1), lambda i: (0, 0)),          # scoring weight (resident)
                pl.BlockSpec(memory_space=pltpu.MemorySpace.SMEM),  # scoring bias scalar
            ],
            out_specs=pl.BlockSpec((1, tile), lambda i: (0, i)),  # lane-dense output slab
        ),
        compiler_params=pltpu.CompilerParams(
            dimension_semantics=("parallel",)),
    )(c, e, W3, ws, b)

    # Drop padding and restore the [N, 1] module output shape (layout only).
    return out_row[0, :N].reshape(N, 1)


def ntn_reference(c, e, W, w_score, b_score):
    # Pure-JAX reference of the PyTorch module semantics.
    v = jnp.einsum("nc,kce,ne->nk", c, W, e)
    v = jnp.maximum(v, 0.0)
    s = v @ w_score + b_score[0, 0]
    return jax.nn.sigmoid(s)


if __name__ == "__main__":
    # Shapes consistent with the module: batch N=300 (non-multiple of 128),
    # c-dim C=32, e-dim E=16, K=8 bilinear slices (K*E = 128).
    N, C, E, K = 300, 32, 16, 8

    key = jax.random.PRNGKey(0)
    kc, ke, kw, kws, kb = jax.random.split(key, 5)

    c = jax.random.normal(kc, (N, C), dtype=jnp.float32)
    e = jax.random.normal(ke, (N, E), dtype=jnp.float32)

    # Deterministic parameters (shapes follow nn.Bilinear(C,E,K) / nn.Linear(K,1)).
    W = jax.random.normal(kw, (K, C, E), dtype=jnp.float32) * 0.05
    w_score = jax.random.normal(kws, (K, 1), dtype=jnp.float32) * 0.1
    b_score = jax.random.normal(kb, (1, 1), dtype=jnp.float32) * 0.1

    ref = ntn_reference(c, e, W, w_score, b_score)

    # 1) Exactness: f32 end-to-end, single padded lane-dense block.
    out_f32 = jax.block_until_ready(
        ntn_forward(c, e, W, w_score, b_score, compute_dtype=jnp.float32))
    assert out_f32.shape == (N, 1)
    assert jnp.allclose(out_f32, ref, atol=1e-5, rtol=1e-5), (out_f32, ref)

    # 2) Default fast path: bf16 operands on the wire / MXU, f32 accumulation.
    out_bf16 = jax.block_until_ready(ntn_forward(c, e, W, w_score, b_score))
    assert out_bf16.shape == (N, 1)
    assert jnp.allclose(out_bf16, ref, atol=2e-2, rtol=2e-2), (out_bf16, ref)

    # 3) Multi-step grid path (batch split across grid steps / TensorCores).
    N2 = 1024
    c2 = jax.random.normal(kc, (N2, C), dtype=jnp.float32)
    e2 = jax.random.normal(ke, (N2, E), dtype=jnp.float32)
    ref2 = ntn_reference(c2, e2, W, w_score, b_score)
    out2 = jax.block_until_ready(
        ntn_forward(c2, e2, W, w_score, b_score, tile_n=256,
                    compute_dtype=jnp.float32))
    assert jnp.allclose(out2, ref2, atol=1e-5, rtol=1e-5), (out2, ref2)

    print("KERNEL_OK")
</pallas_src>

<mosaic_0001>
module attributes {stable_mosaic.version = 11 : i64} {
  func.func @ntn_kernel(%arg0: i32, %arg1: memref<384x32xf32, #tpu.memory_space<vmem>>, %arg2: memref<384x16xf32, #tpu.memory_space<vmem>>, %arg3: memref<128x32xf32, #tpu.memory_space<vmem>>, %arg4: memref<8x1xf32, #tpu.memory_space<vmem>>, %arg5: memref<1x1xf32, #tpu.memory_space<smem>>, %arg6: memref<1x384xf32, #tpu.memory_space<vmem>>) attributes {dimension_semantics = [#tpu.dimension_semantics<parallel>], iteration_bounds = array<i64: 1>, scalar_prefetch = 0 : i64, scratch_operands = 0 : i64, tpu.core_type = #tpu.core_type<tc>, window_params = [{transform_indices = @transform_0, window_bounds = array<i64: 384, 32>}, {transform_indices = @transform_1, window_bounds = array<i64: 384, 16>}, {pipeline_mode = #tpu.pipeline_mode<synchronous>, transform_indices = @transform_2, window_bounds = array<i64: 128, 32>}, {pipeline_mode = #tpu.pipeline_mode<synchronous>, transform_indices = @transform_3, window_bounds = array<i64: 8, 1>}, {transform_indices = @transform_4, window_bounds = array<i64: 1, 1>}, {transform_indices = @transform_5, window_bounds = array<i64: 1, 384>}]} {
    %c0 = arith.constant 0 : index
    %c0_0 = arith.constant 0 : index
    %0 = vector.load %arg3[%c0, %c0_0] : memref<128x32xf32, #tpu.memory_space<vmem>>, vector<128x32xf32>
    %c0_1 = arith.constant 0 : index
    %c0_2 = arith.constant 0 : index
    %1 = vector.load %arg1[%c0_1, %c0_2] : memref<384x32xf32, #tpu.memory_space<vmem>>, vector<384x32xf32>
    %cst = arith.constant dense<0.000000e+00> : vector<128x384xf32>
    %2 = tpu.matmul %0, %1, %cst {dimension_numbers = #tpu.dot_dimension_numbers<[1], [1], [0], [0], [0, 0, 1, 0], [], []>} : vector<128x32xf32>, vector<384x32xf32>, vector<128x384xf32> -> vector<128x384xf32>
    %c0_3 = arith.constant 0 : index
    %c0_4 = arith.constant 0 : index
    %3 = vector.load %arg2[%c0_3, %c0_4] : memref<384x16xf32, #tpu.memory_space<vmem>>, vector<384x16xf32>
    %4 = tpu.transpose %3, [1, 0] : vector<384x16xf32> -> vector<16x384xf32>
    %5 = vector.shape_cast %2 : vector<128x384xf32> to vector<8x16x384xf32>
    %6 = vector.shape_cast %4 : vector<16x384xf32> to vector<1x16x384xf32>
    %7 = vector.broadcast %6 : vector<1x16x384xf32> to vector<8x16x384xf32>
    %8 = arith.mulf %5, %7 : vector<8x16x384xf32>
    %cst_5 = arith.constant dense<0.000000e+00> : vector<8x384xf32>
    %9 = vector.multi_reduction <add>, %8, %cst_5 [1] : vector<8x16x384xf32> to vector<8x384xf32>
    %cst_6 = arith.constant 0.000000e+00 : f32
    %10 = vector.broadcast %cst_6 : f32 to vector<8x384xf32>
    %11 = arith.maximumf %9, %10 : vector<8x384xf32>
    %c0_7 = arith.constant 0 : index
    %c0_8 = arith.constant 0 : index
    %12 = vector.load %arg4[%c0_7, %c0_8] : memref<8x1xf32, #tpu.memory_space<vmem>>, vector<8x1xf32>
    %13 = vector.broadcast %12 : vector<8x1xf32> to vector<8x384xf32>
    %14 = arith.mulf %11, %13 : vector<8x384xf32>
    %cst_9 = arith.constant dense<0.000000e+00> : vector<384xf32>
    %15 = vector.multi_reduction <add>, %14, %cst_9 [0] : vector<8x384xf32> to vector<384xf32>
    %16 = vector.shape_cast %15 : vector<384xf32> to vector<1x384xf32>
    %c0_10 = arith.constant 0 : index
    %c0_11 = arith.constant 0 : index
    %17 = memref.load %arg5[%c0_10, %c0_11] : memref<1x1xf32, #tpu.memory_space<smem>>
    %18 = vector.broadcast %17 : f32 to vector<1x384xf32>
    %19 = arith.addf %16, %18 : vector<1x384xf32>
    %cst_12 = arith.constant 0.000000e+00 : f32
    %20 = vector.broadcast %cst_12 : f32 to vector<1x384xf32>
    %21 = arith.subf %20, %19 : vector<1x384xf32>
    %22 = math.exp %21 : vector<1x384xf32>
    %cst_13 = arith.constant 1.000000e+00 : f32
    %23 = vector.broadcast %cst_13 : f32 to vector<1x384xf32>
    %24 = arith.addf %23, %22 : vector<1x384xf32>
    %cst_14 = arith.constant 1.000000e+00 : f32
    %25 = vector.broadcast %cst_14 : f32 to vector<1x384xf32>
    %26 = arith.divf %25, %24 : vector<1x384xf32>
    %c0_15 = arith.constant 0 : index
    %c0_16 = arith.constant 0 : index
    %27 = vector.load %arg6[%c0_15, %c0_16] : memref<1x384xf32, #tpu.memory_space<vmem>>, vector<1x384xf32>
    tpu.vector_store %arg6[%c0_15, %c0_16], %26 {strides = array<i32>} : memref<1x384xf32, #tpu.memory_space<vmem>>, vector<1x384xf32>,
    return
  }
  func.func @transform_0(%arg0: i32) -> (i32, i32) {
    %c0_i32 = arith.constant 0 : i32
    %c0_i32_0 = arith.constant 0 : i32
    return %arg0, %c0_i32 : i32, i32
  }
  func.func @transform_1(%arg0: i32) -> (i32, i32) {
    %c0_i32 = arith.constant 0 : i32
    %c0_i32_0 = arith.constant 0 : i32
    return %arg0, %c0_i32 : i32, i32
  }
  func.func @transform_2(%arg0: i32) -> (i32, i32) {
    %c0_i32 = arith.constant 0 : i32
    %c0_i32_0 = arith.constant 0 : i32
    %c0_i32_1 = arith.constant 0 : i32
    return %c0_i32, %c0_i32_0 : i32, i32
  }
  func.func @transform_3(%arg0: i32) -> (i32, i32) {
    %c0_i32 = arith.constant 0 : i32
    %c0_i32_0 = arith.constant 0 : i32
    %c0_i32_1 = arith.constant 0 : i32
    return %c0_i32, %c0_i32_0 : i32, i32
  }
  func.func @transform_4(%arg0: i32) -> (i32, i32) {
    %c0_i32 = arith.constant 0 : i32
    %c0_i32_0 = arith.constant 0 : i32
    %c0_i32_1 = arith.constant 0 : i32
    return %c0_i32, %c0_i32_0 : i32, i32
  }
  func.func @transform_5(%arg0: i32) -> (i32, i32) {
    %c0_i32 = arith.constant 0 : i32
    %c0_i32_0 = arith.constant 0 : i32
    return %c0_i32, %arg0 : i32, i32
  }
}

</mosaic_0001>

<bundles_post_ra>
// kernel: tpu_custom_call.1
= control target key start
LH: loop header
LB: loop body
LE: loop exit
PB: predicated region body
PF: predicated region fallthrough
CT: control target
= control target key end

     0   :  { %vm86_vm0 = vcmask 261120   ;;  %v1544_v7 = vmov 0   ;;  %s2206_s0 = inlined_call_operand.vmem [shape: f32[384,32], index: 0, kind: input, shape index: {}]   ;;  %s2207_s1 = inlined_call_operand.vmem [shape: f32[384,16], index: 1, kind: input, shape index: {}]   ;;  %s2208_s2 = inlined_call_operand.vmem [shape: f32[128,32], index: 2, kind: input, shape index: {}]   ;;  %s2209_s3 = inlined_call_operand.vmem [shape: f32[8,1], index: 3, kind: input, shape index: {}]   ;;  %s2210_s4 = inlined_call_operand.<no memory space> [shape: f32[1,1], index: 4, kind: input, shape index: {}]   ;;  %s2211_s5 = inlined_call_operand.hbm [shape: f32[1,384], index: 5, kind: output, shape index: {}]  }
   0x1   :  { %v54_v0 = vld [vmem:[%s2206_s0 + $0x80] sm:$0xff]  ;;  %v55_v1 = vld [vmem:[%s2206_s0 + $0x88] sm:$0xff]  ;;  %vm1588_vm1 = vmpackc.low %vm86_vm0, %vm86_vm0  ;;  %1507 = vset.pattern.permute.xlu0 %v1544_v7 }
   0x2   :  { %v70_v2 = vld [vmem:[%s2206_s0 + $0x100] sm:$0xff]  ;;  %v1408_v3 = vpack.c.bf16 %v55_v1, %v54_v0  ;;  %v71_v5 = vld [vmem:[%s2206_s0 + $0x108] sm:$0xff]  ;;  %v56_v10 = vld [vmem:[%s2206_s0 + $0x90] sm:$0xff] }
   0x3   :  { %v38_v6 = vld [vmem:[%s2206_s0] sm:$0xff]  ;;  %v1456_v8 = vpack.c.bf16 %v71_v5, %v70_v2  ;;  %v39_v9 = vld [vmem:[%s2206_s0 + $0x8] sm:$0xff]  ;;  %v57_v11 = vld [vmem:[%s2206_s0 + $0x98] sm:$0xff] }
   0x4   :  { %1410 = vmatprep.subr.msk.bf16.mxu0 %vm1588_vm1, %v1408_v3  ;;  %v1411_v12 = vpack.c.bf16 %v39_v9, %v38_v6  ;;  %v1414_v13 = vpack.c.bf16 %v57_v11, %v56_v10  ;;  %v72_v14 = vld [vmem:[%s2206_s0 + $0x110] sm:$0xff]  ;;  %v73_v15 = vld [vmem:[%s2206_s0 + $0x118] sm:$0xff]  ;;  %v58_v19 = vld [vmem:[%s2206_s0 + $0xa0] sm:$0xff] }
   0x5   :  { %1458 = vmatprep.subr.msk.bf16.mxu1 %vm1588_vm1, %v1456_v8  ;;  %v1462_v16 = vpack.c.bf16 %v73_v15, %v72_v14  ;;  %v40_v17 = vld [vmem:[%s2206_s0 + $0x10] sm:$0xff]  ;;  %v41_v18 = vld [vmem:[%s2206_s0 + $0x18] sm:$0xff]  ;;  %v59_v20 = vld [vmem:[%s2206_s0 + $0xa8] sm:$0xff] }
   0x6   :  { %1413 = vmatpush3.bf16.xpose.msk.msra.mxu0 %vm1588_vm1, %v1411_v12  ;;  %1461 = vmatpush3.bf16.xpose.msk.msra.mxu1 %vm1588_vm1, %v1456_v8  ;;  %v74_v21 = vld [vmem:[%s2206_s0 + $0x120] sm:$0xff]  ;;  %v75_v22 = vld [vmem:[%s2206_s0 + $0x128] sm:$0xff]  ;;  %v1417_v23 = vpack.c.bf16 %v41_v18, %v40_v17  ;;  %v1420_v24 = vpack.c.bf16 %v59_v20, %v58_v19  ;;  %v60_v28 = vld [vmem:[%s2206_s0 + $0xb0] sm:$0xff] }
   0x7   :  { %1416 = vmatprep.subr.msk.bf16.mxu0 %vm1588_vm1, %v1414_v13  ;;  %1464 = vmatprep.subr.msk.bf16.mxu1 %vm1588_vm1, %v1462_v16  ;;  %v1468_v25 = vpack.c.bf16 %v75_v22, %v74_v21  ;;  %v42_v26 = vld [vmem:[%s2206_s0 + $0x20] sm:$0xff]  ;;  %v43_v27 = vld [vmem:[%s2206_s0 + $0x28] sm:$0xff]  ;;  %v61_v29 = vld [vmem:[%s2206_s0 + $0xb8] sm:$0xff] }
   0x8   :  { %v76_v30 = vld [vmem:[%s2206_s0 + $0x130] sm:$0xff]  ;;  %v77_v31 = vld [vmem:[%s2206_s0 + $0x138] sm:$0xff]  ;;  %v1672_v32 = vld [vmem:[%s2208_s2] sm:$0xff]  ;;  %v1423_v33 = vpack.c.bf16 %v43_v27, %v42_v26  ;;  %v1426_v34 = vpack.c.bf16 %v61_v29, %v60_v28 }
   0x9   :  { %1288 = vmatprep.mubr.msk.f32.mxu0 %vm86_vm0, %v1672_v32  ;;  %1384 = vmatprep.mubr.msk.f32.mxu1 %vm86_vm0, %v1672_v32  ;;  %v1474_v35 = vpack.c.bf16 %v77_v31, %v76_v30  ;;  %v601_v36 = vld [vmem:[%s2207_s1 + $0x80] sm:$0xff]  ;;  %v602_v37 = vld [vmem:[%s2207_s1 + $0x88] sm:$0xff]  ;;  %v44_v38 = vld [vmem:[%s2206_s0 + $0x30] sm:$0xff] }
   0xa   :  { %665 = vxpose.xlu1.b32.start [1/16] (narrow) %v601_v36, 16  ;;  %v45_v39 = vld [vmem:[%s2206_s0 + $0x38] sm:$0xff]  ;;  %v62_v40 = vld [vmem:[%s2206_s0 + $0xc0] sm:$0xff]  ;;  %v63_v41 = vld [vmem:[%s2206_s0 + $0xc8] sm:$0xff] }
   0xb   :  { %v78_v42 = vld [vmem:[%s2206_s0 + $0x140] sm:$0xff]  ;;  %v79_v43 = vld [vmem:[%s2206_s0 + $0x148] sm:$0xff]  ;;  %v1429_v45 = vpack.c.bf16 %v45_v39, %v44_v38  ;;  %v603_v46 = vld [vmem:[%s2207_s1 + $0x90] sm:$0xff]  ;;  %v1432_v47 = vpack.c.bf16 %v63_v41, %v62_v40 }
   0xc   :  { %v969_v44 = vld [vmem:[%s2209_s3] sm:$0xff]  ;;  %v1480_v48 = vpack.c.bf16 %v79_v43, %v78_v42  ;;  %v604_v49 = vld [vmem:[%s2207_s1 + $0x98] sm:$0xff]  ;;  %v47_v51 = vld [vmem:[%s2206_s0 + $0x48] sm:$0xff] }
   0xd   :  { %972 = vperm.xlu0 %1507, %v969_v44   ;;  %v46_v50 = vld [vmem:[%s2206_s0 + $0x40] sm:$0xff]  ;;  %v64_v52 = vld [vmem:[%s2206_s0 + $0xd0] sm:$0xff]  ;;  %v65_v53 = vld [vmem:[%s2206_s0 + $0xd8] sm:$0xff] }
   0xe   :  { %1419 = vmatpush3.bf16.xpose.msk.msra.mxu0 %vm1588_vm1, %v1417_v23  ;;  %1467 = vmatpush3.bf16.xpose.msk.msra.mxu1 %vm1588_vm1, %v1462_v16  ;;  %v80_v54 = vld [vmem:[%s2206_s0 + $0x150] sm:$0xff]  ;;  %v81_v55 = vld [vmem:[%s2206_s0 + $0x158] sm:$0xff]  ;;  %v1435_v56 = vpack.c.bf16 %v47_v51, %v46_v50  ;;  %v605_v57 = vld [vmem:[%s2207_s1 + $0xa0] sm:$0xff]  ;;  %v1438_v58 = vpack.c.bf16 %v65_v53, %v64_v52 }
   0xf   :  { %1422 = vmatprep.subr.msk.bf16.mxu0 %vm1588_vm1, %v1420_v24  ;;  %1470 = vmatprep.subr.msk.bf16.mxu1 %vm1588_vm1, %v1468_v25  ;;  %v1486_v59 = vpack.c.bf16 %v81_v55, %v80_v54  ;;  %v48_v60 = vld [vmem:[%s2206_s0 + $0x50] sm:$0xff]  ;;  %v606_v61 = vld [vmem:[%s2207_s1 + $0xa8] sm:$0xff]  ;;  %v49_v62 = vld [vmem:[%s2206_s0 + $0x58] sm:$0xff] }
  0x10   :  { %666 = vxpose.xlu1.b32.cont [2/16] (narrow) %v602_v37, 16  ;;  %v66_v63 = vld [vmem:[%s2206_s0 + $0xe0] sm:$0xff] }
  0x14   :  { %667 = vxpose.xlu1.b32.cont [3/16] (narrow) %v603_v46, 16 }
  0x16   :  { %1425 = vmatpush3.bf16.xpose.msk.msra.mxu0 %vm1588_vm1, %v1423_v33  ;;  %1473 = vmatpush3.bf16.xpose.msk.msra.mxu1 %vm1588_vm1, %v1468_v25 }
  0x17   :  { %1428 = vmatprep.subr.msk.bf16.mxu0 %vm1588_vm1, %v1426_v34  ;;  %1476 = vmatprep.subr.msk.bf16.mxu1 %vm1588_vm1, %v1474_v35 }
  0x18   :  { %668 = vxpose.xlu1.b32.cont [4/16] (narrow) %v604_v49, 16 }
  0x1c   :  { %669 = vxpose.xlu1.b32.cont [5/16] (narrow) %v605_v57, 16 }
  0x1e   :  { %1431 = vmatpush3.bf16.xpose.msk.msra.mxu0 %vm1588_vm1, %v1429_v45  ;;  %1479 = vmatpush3.bf16.xpose.msk.msra.mxu1 %vm1588_vm1, %v1474_v35 }
  0x1f   :  { %1434 = vmatprep.subr.msk.bf16.mxu0 %vm1588_vm1, %v1432_v47  ;;  %1482 = vmatprep.subr.msk.bf16.mxu1 %vm1588_vm1, %v1480_v48 }
  0x26   :  { %1437 = vmatpush3.bf16.xpose.msk.msra.mxu0 %vm1588_vm1, %v1435_v56  ;;  %1485 = vmatpush3.bf16.xpose.msk.msra.mxu1 %vm1588_vm1, %v1480_v48 }
  0x27   :  { %1440 = vmatprep.subr.msk.bf16.mxu0 %vm1588_vm1, %v1438_v58  ;;  %1488 = vmatprep.subr.msk.bf16.mxu1 %vm1588_vm1, %v1486_v59 }
  0x28   :  { %11 = vsyncpa [#allocation4], 0  ;;  %v67_v0 = vld [vmem:[%s2206_s0 + $0xe8] sm:$0xff]  ;;  %v82_v1 = vld [vmem:[%s2206_s0 + $0x160] sm:$0xff]  ;;  %670 = vxpose.xlu1.b32.cont [6/16] (narrow) %v606_v61, 16  ;;  %v1441_v3 = vpack.c.bf16 %v49_v62, %v48_v60  ;;  %vm1038_vm2 = vcmask 1041409  }
  0x29   :  { %v83_v2 = vld [vmem:[%s2206_s0 + $0x168] sm:$0xff]  ;;  %v607_v5 = vld [vmem:[%s2207_s1 + $0xb0] sm:$0xff]  ;;  %v1444_v6 = vpack.c.bf16 %v67_v0, %v66_v63  ;;  %v608_v8 = vld [vmem:[%s2207_s1 + $0xb8] sm:$0xff]  ;;  %vm1041_vm3 = vcmask 1042434   ;;  %vm1044_vm4 = vcmask 1043459   ;;  %vm1047_vm5 = vcmask 1044484  }
  0x2a   :  { %v1492_v7 = vpack.c.bf16 %v83_v2, %v82_v1  ;;  %v50_v9 = vld [vmem:[%s2206_s0 + $0x60] sm:$0xff]  ;;  %v51_v10 = vld [vmem:[%s2206_s0 + $0x68] sm:$0xff]  ;;  %v68_v11 = vld [vmem:[%s2206_s0 + $0xf0] sm:$0xff]  ;;  %vm1050_vm6 = vcmask 1045509   ;;  %vm1053_vm7 = vcmask 1046534   ;;  %vm1056_vm8 = vcmask 1047559  }
  0x2b   :  { %v69_v12 = vld [vmem:[%s2206_s0 + $0xf8] sm:$0xff]  ;;  %v84_v13 = vld [vmem:[%s2206_s0 + $0x170] sm:$0xff]  ;;  %v1447_v15 = vpack.c.bf16 %v51_v10, %v50_v9  ;;  %v609_v16 = vld [vmem:[%s2207_s1 + $0xc0] sm:$0xff] }
  0x2c   :  { %671 = vxpose.xlu1.b32.cont [7/16] (narrow) %v607_v5, 16  ;;  %v85_v14 = vld [vmem:[%s2206_s0 + $0x178] sm:$0xff]  ;;  %v1450_v17 = vpack.c.bf16 %v69_v12, %v68_v11  ;;  %v585_v19 = vld [vmem:[%s2207_s1] sm:$0xff]  ;;  %v610_v20 = vld [vmem:[%s2207_s1 + $0xc8] sm:$0xff] }
  0x2d   :  { %v1498_v18 = vpack.c.bf16 %v85_v14, %v84_v13  ;;  %v52_v21 = vld [vmem:[%s2206_s0 + $0x70] sm:$0xff]  ;;  %v53_v22 = vld [vmem:[%s2206_s0 + $0x78] sm:$0xff]  ;;  %633 = vxpose.xlu0.b32.start [1/16] (narrow) %v585_v19, 16  ;;  %v586_v23 = vld [vmem:[%s2207_s1 + $0x8] sm:$0xff] }
  0x2e   :  { %1443 = vmatpush3.bf16.xpose.msk.msra.mxu0 %vm1588_vm1, %v1441_v3  ;;  %1491 = vmatpush3.bf16.xpose.msk.msra.mxu1 %vm1588_vm1, %v1486_v59  ;;  %v1453_v24 = vpack.c.bf16 %v53_v22, %v52_v21  ;;  %v611_v25 = vld [vmem:[%s2207_s1 + $0xd0] sm:$0xff]  ;;  %v612_v27 = vld [vmem:[%s2207_s1 + $0xd8] sm:$0xff]  ;;  %v23_v29 = vld [vmem:[%s2208_s2 + $0x8] sm:$0xff] }
  0x2f   :  { %1446 = vmatprep.subr.msk.bf16.mxu0 %vm1588_vm1, %v1444_v6  ;;  %1494 = vmatprep.subr.msk.bf16.mxu1 %vm1588_vm1, %v1492_v7  ;;  %v587_v26 = vld [vmem:[%s2207_s1 + $0x10] sm:$0xff]  ;;  %v588_v28 = vld [vmem:[%s2207_s1 + $0x18] sm:$0xff]  ;;  %v613_v4 = vld [vmem:[%s2207_s1 + $0xe0] sm:$0xff] }
  0x30   :  { %672 = vxpose.xlu1.b32.cont [8/16] (narrow) %v608_v8, 16  ;;  %v24_v30 = vld [vmem:[%s2208_s2 + $0x10] sm:$0xff]  ;;  %v589_v31 = vld [vmem:[%s2207_s1 + $0x20] sm:$0xff]  ;;  %v25_v33 = vld [vmem:[%s2208_s2 + $0x18] sm:$0xff] }
  0x31   :  { %634 = vxpose.xlu0.b32.cont [2/16] (narrow) %v586_v23, 16  ;;  %v26_v34 = vld [vmem:[%s2208_s2 + $0x20] sm:$0xff]  ;;  %v590_v35 = vld [vmem:[%s2207_s1 + $0x28] sm:$0xff]  ;;  %v28_v37 = vld [vmem:[%s2208_s2 + $0x30] sm:$0xff] }
  0x32   :  { %v27_v36 = vld [vmem:[%s2208_s2 + $0x28] sm:$0xff]  ;;  %v615_v38 = vld [vmem:[%s2207_s1 + $0xf0] sm:$0xff]  ;;  %v29_v40 = vld [vmem:[%s2208_s2 + $0x38] sm:$0xff] }
  0x33   :  { %v591_v39 = vld [vmem:[%s2207_s1 + $0x30] sm:$0xff]  ;;  %v30_v41 = vld [vmem:[%s2208_s2 + $0x40] sm:$0xff]  ;;  %v616_v42 = vld [vmem:[%s2207_s1 + $0xf8] sm:$0xff] }
  0x34   :  { %673 = vxpose.xlu1.b32.cont [9/16] (narrow) %v609_v16, 16  ;;  %v592_v43 = vld [vmem:[%s2207_s1 + $0x38] sm:$0xff]  ;;  %v31_v44 = vld [vmem:[%s2208_s2 + $0x48] sm:$0xff]  ;;  %v32_v45 = vld [vmem:[%s2208_s2 + $0x50] sm:$0xff] }
  0x35   :  { %635 = vxpose.xlu0.b32.cont [3/16] (narrow) %v587_v26, 16  ;;  %v617_v46 = vld [vmem:[%s2207_s1 + $0x100] sm:$0xff]  ;;  %v33_v48 = vld [vmem:[%s2208_s2 + $0x58] sm:$0xff]  ;;  %v618_v50 = vld [vmem:[%s2207_s1 + $0x108] sm:$0xff] }
  0x36   :  { %1449 = vmatpush3.bf16.xpose.msk.msra.mxu0 %vm1588_vm1, %v1447_v15  ;;  %1497 = vmatpush3.bf16.xpose.msk.msra.mxu1 %vm1588_vm1, %v1492_v7  ;;  %v593_v47 = vld [vmem:[%s2207_s1 + $0x40] sm:$0xff]  ;;  %v594_v51 = vld [vmem:[%s2207_s1 + $0x48] sm:$0xff]  ;;  %v36_v53 = vld [vmem:[%s2208_s2 + $0x70] sm:$0xff] }
  0x37   :  { %1452 = vmatprep.subr.msk.bf16.mxu0 %vm1588_vm1, %v1450_v17  ;;  %1500 = vmatprep.subr.msk.bf16.mxu1 %vm1588_vm1, %v1498_v18  ;;  %v34_v49 = vld [vmem:[%s2208_s2 + $0x60] sm:$0xff]  ;;  %v35_v52 = vld [vmem:[%s2208_s2 + $0x68] sm:$0xff]  ;;  %v619_v54 = vld [vmem:[%s2207_s1 + $0x110] sm:$0xff] }
  0x38   :  { %674 = vxpose.xlu1.b32.cont [10/16] (narrow) %v610_v20, 16  ;;  %v595_v55 = vld [vmem:[%s2207_s1 + $0x50] sm:$0xff]  ;;  %v37_v56 = vld [vmem:[%s2208_s2 + $0x78] sm:$0xff]  ;;  %v621_v59 = vld [vmem:[%s2207_s1 + $0x120] sm:$0xff] }
  0x39   :  { %636 = vxpose.xlu0.b32.cont [4/16] (narrow) %v588_v28, 16  ;;  %v620_v57 = vld [vmem:[%s2207_s1 + $0x118] sm:$0xff]  ;;  %v597_v60 = vld [vmem:[%s2207_s1 + $0x60] sm:$0xff]  ;;  %v622_v61 = vld [vmem:[%s2207_s1 + $0x128] sm:$0xff] }
  0x3a   :  { %v596_v58 = vld [vmem:[%s2207_s1 + $0x58] sm:$0xff]  ;;  %v598_v62 = vld [vmem:[%s2207_s1 + $0x68] sm:$0xff]  ;;  %v623_v63 = vld [vmem:[%s2207_s1 + $0x130] sm:$0xff] }
  0x3b   :  { %v599_v0 = vld [vmem:[%s2207_s1 + $0x70] sm:$0xff]  ;;  %v624_v1 = vld [vmem:[%s2207_s1 + $0x138] sm:$0xff]  ;;  %v625_v3 = vld [vmem:[%s2207_s1 + $0x140] sm:$0xff] }
  0x3c   :  { %675 = vxpose.xlu1.b32.cont [11/16] (narrow) %v611_v25, 16  ;;  %v600_v2 = vld [vmem:[%s2207_s1 + $0x78] sm:$0xff]  ;;  %v626_v5 = vld [vmem:[%s2207_s1 + $0x148] sm:$0xff]  ;;  %v627_v6 = vld [vmem:[%s2207_s1 + $0x150] sm:$0xff] }
  0x3d   :  { %637 = vxpose.xlu0.b32.cont [5/16] (narrow) %v589_v31, 16  ;;  %v628_v7 = vld [vmem:[%s2207_s1 + $0x158] sm:$0xff]  ;;  %v629_v8 = vld [vmem:[%s2207_s1 + $0x160] sm:$0xff]  ;;  %v630_v9 = vld [vmem:[%s2207_s1 + $0x168] sm:$0xff] }
  0x3e   :  { %1455 = vmatpush3.bf16.xpose.msk.msra.mxu0 %vm1588_vm1, %v1453_v24  ;;  %1503 = vmatpush3.bf16.xpose.msk.msra.mxu1 %vm1588_vm1, %v1498_v18  ;;  %v631_v10 = vld [vmem:[%s2207_s1 + $0x170] sm:$0xff]  ;;  %v632_v11 = vld [vmem:[%s2207_s1 + $0x178] sm:$0xff] }
  0x40   :  { %676 = vxpose.xlu1.b32.cont [12/16] (narrow) %v612_v27, 16 }
  0x41   :  { %638 = vxpose.xlu0.b32.cont [6/16] (narrow) %v590_v35, 16 }
  0x44   :  { %677 = vxpose.xlu1.b32.cont [13/16] (narrow) %v613_v4, 16 }
  0x45   :  { %1289 = vmatmul.mubr.msk.f32.vlgmr.msra.gmra.mrb[0].mxu0 %vm86_vm0, %v1672_v32  ;;  %1385 = vmatmul.mubr.msk.f32.vlgmr.msra.gmra.mrb[0].mxu1 %vm86_vm0, %v23_v29  ;;  %v614_v32 = vld [vmem:[%s2207_s1 + $0xe8] sm:$0xff] }
  0x46   :  { %1290 = vmatprep.mubr.msk.f32.mxu0 %vm86_vm0, %v23_v29  ;;  %1387 = vmatprep.mubr.msk.f32.mxu1 %vm86_vm0, %v24_v30 }
  0x47   :  { %639 = vxpose.xlu0.b32.cont [7/16] (narrow) %v591_v39, 16 }
  0x48   :  { %678 = vxpose.xlu1.b32.cont [14/16] (narrow) %v614_v32, 16 }
  0x49   :  { %1291 = vmatmul.mubr.msk.f32.gmra.mrb[2].mxu0 %vm86_vm0, %v23_v29  ;;  %1388 = vmatmul.mubr.msk.f32.gmra.mrb[2].mxu1 %vm86_vm0, %v25_v33 }
  0x4a   :  { %1292 = vmatprep.mubr.msk.f32.mxu0 %vm86_vm0, %v24_v30  ;;  %1390 = vmatprep.mubr.msk.f32.mxu1 %vm86_vm0, %v26_v34 }
  0x4b   :  { %640 = vxpose.xlu0.b32.cont [8/16] (narrow) %v592_v43, 16 }
  0x4c   :  { %679 = vxpose.xlu1.b32.cont [15/16] (narrow) %v615_v38, 16 }
  0x4d   :  { %1293 = vmatmul.mubr.msk.f32.gmra.mrb[4].mxu0 %vm86_vm0, %v24_v30  ;;  %1391 = vmatmul.mubr.msk.f32.gmra.mrb[4].mxu1 %vm86_vm0, %v27_v36 }
  0x4e   :  { %1294 = vmatprep.mubr.msk.f32.mxu0 %vm86_vm0, %v25_v33  ;;  %1393 = vmatprep.mubr.msk.f32.mxu1 %vm86_vm0, %v28_v37 }
  0x4f   :  { %641 = vxpose.xlu0.b32.cont [9/16] (narrow) %v593_v47, 16 }
  0x50   :  { %680 = vxpose.xlu1.b32.end [16/16] (narrow) %v616_v42, 16 }
  0x51   :  { %1295 = vmatmul.mubr.msk.f32.gmra.mrb[6].mxu0 %vm86_vm0, %v25_v33  ;;  %1394 = vmatmul.mubr.msk.f32.gmra.mrb[6].mxu1 %vm86_vm0, %v29_v40 }
  0x52   :  { %1296 = vmatprep.mubr.msk.f32.mxu0 %vm86_vm0, %v26_v34  ;;  %1396 = vmatprep.mubr.msk.f32.mxu1 %vm86_vm0, %v30_v41 }
  0x53   :  { %642 = vxpose.xlu0.b32.cont [10/16] (narrow) %v594_v51, 16 }
  0x54   :  { %697 = vxpose.xlu1.b32.start [1/16] (narrow) %v617_v46, 16 }
  0x55   :  { %1297 = vmatmul.mubr.msk.f32.gmra.mrb[8].mxu0 %vm86_vm0, %v26_v34  ;;  %1397 = vmatmul.mubr.msk.f32.gmra.mrb[8].mxu1 %vm86_vm0, %v31_v44 }
  0x56   :  { %1298 = vmatprep.mubr.msk.f32.mxu0 %vm86_vm0, %v27_v36  ;;  %1399 = vmatprep.mubr.msk.f32.mxu1 %vm86_vm0, %v32_v45 }
  0x57   :  { %643 = vxpose.xlu0.b32.cont [11/16] (narrow) %v595_v55, 16 }
  0x58   :  { %698 = vxpose.xlu1.b32.cont [2/16] (narrow) %v618_v50, 16 }
  0x59   :  { %1299 = vmatmul.mubr.msk.f32.gmra.mrb[10].mxu0 %vm86_vm0, %v27_v36  ;;  %1400 = vmatmul.mubr.msk.f32.gmra.mrb[10].mxu1 %vm86_vm0, %v33_v48 }
  0x5a   :  { %1300 = vmatprep.mubr.msk.f32.mxu0 %vm86_vm0, %v28_v37  ;;  %1402 = vmatprep.mubr.msk.f32.mxu1 %vm86_vm0, %v34_v49 }
  0x5b   :  { %644 = vxpose.xlu0.b32.cont [12/16] (narrow) %v596_v58, 16 }
  0x5c   :  { %699 = vxpose.xlu1.b32.cont [3/16] (narrow) %v619_v54, 16 }
  0x5d   :  { %1301 = vmatmul.mubr.msk.f32.gmra.mrb[12].mxu0 %vm86_vm0, %v28_v37  ;;  %1403 = vmatmul.mubr.msk.f32.gmra.mrb[12].mxu1 %vm86_vm0, %v35_v52 }
  0x5e   :  { %1302 = vmatprep.mubr.msk.f32.mxu0 %vm86_vm0, %v29_v40  ;;  %1405 = vmatprep.mubr.msk.f32.mxu1 %vm86_vm0, %v36_v53 }
  0x5f   :  { %645 = vxpose.xlu0.b32.cont [13/16] (narrow) %v597_v60, 16 }
  0x60   :  { %700 = vxpose.xlu1.b32.cont [4/16] (narrow) %v620_v57, 16 }
  0x61   :  { %1303 = vmatmul.mubr.msk.f32.gmra.mrb[14].mxu0 %vm86_vm0, %v29_v40  ;;  %1406 = vmatmul.mubr.msk.f32.gmra.mrb[14].mxu1 %vm86_vm0, %v37_v56 }
  0x62   :  { %1304 = vmatprep.mubr.msk.f32.mxu0 %vm86_vm0, %v30_v41 }
  0x63   :  { %646 = vxpose.xlu0.b32.cont [14/16] (narrow) %v598_v62, 16 }
  0x64   :  { %701 = vxpose.xlu1.b32.cont [5/16] (narrow) %v621_v59, 16 }
  0x65   :  { %1305 = vmatmul.mubr.msk.f32.gmra.mrb[16].mxu0 %vm86_vm0, %v30_v41 }
  0x66   :  { %1306 = vmatprep.mubr.msk.f32.mxu0 %vm86_vm0, %v31_v44 }
  0x67   :  { %647 = vxpose.xlu0.b32.cont [15/16] (narrow) %v599_v0, 16 }
  0x68   :  { %702 = vxpose.xlu1.b32.cont [6/16] (narrow) %v622_v61, 16 }
  0x69   :  { %1307 = vmatmul.mubr.msk.f32.gmra.mrb[18].mxu0 %vm86_vm0, %v31_v44 }
  0x6a   :  { %1308 = vmatprep.mubr.msk.f32.mxu0 %vm86_vm0, %v32_v45 }
  0x6b   :  { %648 = vxpose.xlu0.b32.end [16/16] (narrow) %v600_v2, 16 }
  0x6c   :  { %703 = vxpose.xlu1.b32.cont [7/16] (narrow) %v623_v63, 16 }
  0x6d   :  { %1309 = vmatmul.mubr.msk.f32.gmra.mrb[20].mxu0 %vm86_vm0, %v32_v45 }
  0x6e   :  { %1310 = vmatprep.mubr.msk.f32.mxu0 %vm86_vm0, %v33_v48 }
  0x70   :  { %704 = vxpose.xlu1.b32.cont [8/16] (narrow) %v624_v1, 16 }
  0x71   :  { %1311 = vmatmul.mubr.msk.f32.gmra.mrb[22].mxu0 %vm86_vm0, %v33_v48 }
  0x72   :  { %1312 = vmatprep.mubr.msk.f32.mxu0 %vm86_vm0, %v34_v49 }
  0x74   :  { %705 = vxpose.xlu1.b32.cont [9/16] (narrow) %v625_v3, 16 }
  0x75   :  { %1313 = vmatmul.mubr.msk.f32.gmra.mrb[24].mxu0 %vm86_vm0, %v34_v49 }
  0x76   :  { %1314 = vmatprep.mubr.msk.f32.mxu0 %vm86_vm0, %v35_v52 }
  0x78   :  { %706 = vxpose.xlu1.b32.cont [10/16] (narrow) %v626_v5, 16 }
  0x79   :  { %1315 = vmatmul.mubr.msk.f32.gmra.mrb[26].mxu0 %vm86_vm0, %v35_v52 }
  0x7a   :  { %1316 = vmatprep.mubr.msk.f32.mxu0 %vm86_vm0, %v36_v53 }
  0x7c   :  { %707 = vxpose.xlu1.b32.cont [11/16] (narrow) %v627_v6, 16 }
  0x7d   :  { %1317 = vmatmul.mubr.msk.f32.gmra.mrb[28].mxu0 %vm86_vm0, %v36_v53 }
  0x7e   :  { %1318 = vmatprep.mubr.msk.f32.mxu0 %vm86_vm0, %v37_v56 }
  0x80   :  { %708 = vxpose.xlu1.b32.cont [12/16] (narrow) %v628_v7, 16 }
  0x81   :  { %1319 = vmatmul.mubr.msk.f32.gmra.mrb[30].mxu0 %vm86_vm0, %v37_v56 }
  0x84   :  { %709 = vxpose.xlu1.b32.cont [13/16] (narrow) %v629_v8, 16 }
  0x88   :  { %710 = vxpose.xlu1.b32.cont [14/16] (narrow) %v630_v9, 16 }
  0x8c   :  { %711 = vxpose.xlu1.b32.cont [15/16] (narrow) %v631_v10, 16  ;;  %v2043_v14 = vpop.permute.xlu0 %972 }
  0x8d   :  { %v2062_v37 = vrot.slane %v2043_v14, 1  ;;  %v2065_v38 = vrot.slane %v2043_v14, 2  ;;  %v2068_v44 = vrot.slane %v2043_v14, 3  ;;  %v2072_v49 = vrot.slane %v2043_v14, 4 }
  0x8e   :  { %v2075_v50 = vrot.slane %v2043_v14, 5  ;;  %v2078_v54 = vrot.slane %v2043_v14, 6  ;;  %v2083_v58 = vrot.slane %v2043_v14, 7 }
  0x90   :  { %712 = vxpose.xlu1.b32.end [16/16] (narrow) %v632_v11, 16 }
  0x94   :  { %v2039_v12 = vpop.trf.xlu1 }
  0x98   :  { %v2041_v13 = vpop.trf.xlu1 }
  0xaf   :  { %v2047_v16 = vpop.trf.xlu0 }
  0xb3   :  { %v2053_v24 = vpop.trf.xlu0 }
  0xd4   :  { %v2045_v15 = vpop.trf.xlu1 }
  0xd8   :  { %v2049_v17 = vpop.trf.xlu1 }
 0x118   :  { %v345_v18 = vpop.f32.mrb[0].mxu0  ;;  %v1386_v19 = vpop.f32.mrb[0].mxu1 }
 0x119   :  { %v347_v20 = vpop.f32.mrb[1].mxu0  ;;  %v506_v21 = vpop.f32.mrb[1].mxu1  ;;  %v734_v22 = vmul.f32 %v1386_v19, %v2049_v17  ;;  %v729_v28 = vmul.f32 %v2047_v16, %v345_v18 }
 0x11a   :  { %v731_v23 = vmul.f32 %v2045_v15, %v506_v21  ;;  %v730_v33 = vmul.f32 %v2039_v12, %v347_v20 }
 0x11c   :  { %v791_v25 = vadd.f32 %v734_v22, %v731_v23  ;;  %v351_v26 = vpop.f32.mrb[2].mxu0  ;;  %v1389_v27 = vpop.f32.mrb[2].mxu1 }
 0x11d   :  { %v732_v29 = vmul.f32 %v2053_v24, %v351_v26  ;;  %v740_v30 = vmul.f32 %v1389_v27, %v2049_v17  ;;  %v353_v4 = vpop.f32.mrb[3].mxu0  ;;  %v516_v31 = vpop.f32.mrb[3].mxu1 }
 0x11e   :  { %v792_v34 = vrot.slane %v791_v25, 4  ;;  %v733_v32 = vmul.f32 %v2041_v13, %v353_v4  ;;  %v737_v35 = vmul.f32 %v2045_v15, %v516_v31 }
 0x11f   :  { %v777_v36 = vadd.f32 %v732_v29, %v729_v28 }
 0x120   :  { %v793_v39 = vadd.f32 %v792_v34, %v791_v25  ;;  %v784_v40 = vadd.f32 %v733_v32, %v730_v33  ;;  %v812_v41 = vadd.f32 %v740_v30, %v737_v35  ;;  %v357_v42 = vpop.f32.mrb[4].mxu0  ;;  %v1392_v43 = vpop.f32.mrb[4].mxu1 }
 0x121   :  { %v778_v45 = vrot.slane %v777_v36, 4  ;;  %v746_v46 = vmul.f32 %v1392_v43, %v2049_v17  ;;  %v359_v47 = vpop.f32.mrb[5].mxu0  ;;  %v526_v48 = vpop.f32.mrb[5].mxu1  ;;  %v735_v56 = vmul.f32 %v2047_v16, %v357_v42 }
 0x122   :  { %v794_v51 = vrot.slane %v793_v39, 2  ;;  %v785_v52 = vrot.slane %v784_v40, 4  ;;  %v813_v53 = vrot.slane %v812_v41, 4  ;;  %v743_v57 = vmul.f32 %v2045_v15, %v526_v48 }
 0x123   :  { %v779_v55 = vadd.f32 %v778_v45, %v777_v36  ;;  %v736_v62 = vmul.f32 %v2039_v12, %v359_v47 }
 0x124   :  { %v795_v59 = vadd.f32 %v794_v51, %v793_v39  ;;  %v786_v60 = vadd.f32 %v785_v52, %v784_v40  ;;  %v814_v61 = vadd.f32 %v813_v53, %v812_v41  ;;  %v363_v63 = vpop.f32.mrb[6].mxu0  ;;  %v1395_v0 = vpop.f32.mrb[6].mxu1  ;;  %v833_v2 = vadd.f32 %v746_v46, %v743_v57 }
 0x125   :  { %v780_v1 = vrot.slane %v779_v55, 2  ;;  %v738_v3 = vmul.f32 %v2053_v24, %v363_v63  ;;  %v752_v5 = vmul.f32 %v1395_v0, %v2049_v17  ;;  %v365_v6 = vpop.f32.mrb[7].mxu0  ;;  %v536_v7 = vpop.f32.mrb[7].mxu1 }
 0x126   :  { %v796_v8 = vrot.slane %v795_v59, 1  ;;  %v787_v9 = vrot.slane %v786_v60, 2  ;;  %v815_v10 = vrot.slane %v814_v61, 2  ;;  %v739_v11 = vmul.f32 %v2041_v13, %v365_v6 }
 0x127   :  { %v781_v18 = vadd.f32 %v780_v1, %v779_v55  ;;  %v834_v19 = vrot.slane %v833_v2, 4  ;;  %v798_v20 = vadd.f32 %v738_v3, %v735_v56  ;;  %v749_v21 = vmul.f32 %v2045_v15, %v536_v7 }
 0x128   :  { %v797_v22 = vadd.f32 %v796_v8, %v795_v59  ;;  %v788_v23 = vadd.f32 %v787_v9, %v786_v60  ;;  %v816_v25 = vadd.f32 %v815_v10, %v814_v61  ;;  %v805_v26 = vadd.f32 %v739_v11, %v736_v62  ;;  %v369_v27 = vpop.f32.mrb[8].mxu0  ;;  %v1398_v28 = vpop.f32.mrb[8].mxu1 }
 0x129   :  { %v782_v29 = vrot.slane %v781_v18, 1  ;;  %v835_v30 = vadd.f32 %v834_v19, %v833_v2  ;;  %v799_v4 = vrot.slane %v798_v20, 4  ;;  %v854_v31 = vadd.f32 %v752_v5, %v749_v21  ;;  %v371_v33 = vpop.f32.mrb[9].mxu0  ;;  %v546_v34 = vpop.f32.mrb[9].mxu1 }
 0x12a   :  { %v947_v32 = vmax.f32 %v797_v22, 0.0  ;;  %v789_v35 = vrot.slane %v788_v23, 1  ;;  %v817_v36 = vrot.slane %v816_v25, 1  ;;  %v806_v39 = vrot.slane %v805_v26, 4 }
 0x12b   :  { %v783_v40 = vadd.f32 %v782_v29, %v781_v18  ;;  %v836_v41 = vrot.slane %v835_v30, 2  ;;  %v800_v42 = vadd.f32 %v799_v4, %v798_v20  ;;  %v855_v43 = vrot.slane %v854_v31, 4 }
 0x12c   :  { %v991_v45 = vmul.f32 %v2043_v14, %v947_v32  ;;  %v790_v46 = vadd.f32 %v789_v35, %v788_v23  ;;  %v818_v47 = vadd.f32 %v817_v36, %v816_v25  ;;  %v807_v48 = vadd.f32 %v806_v39, %v805_v26  ;;  %v375_v51 = vpop.f32.mrb[10].mxu0  ;;  %v1401_v52 = vpop.f32.mrb[10].mxu1 }
 0x12d   :  { %v945_v53 = vmax.f32 %v783_v40, 0.0  ;;  %v837_v55 = vadd.f32 %v836_v41, %v835_v30  ;;  %v801_v56 = vrot.slane %v800_v42, 2  ;;  %v856_v57 = vadd.f32 %v855_v43, %v854_v31  ;;  %v377_v59 = vpop.f32.mrb[11].mxu0  ;;  %v556_v60 = vpop.f32.mrb[11].mxu1 }
 0x12e   :  { %v946_v61 = vmax.f32 %v790_v46, 0.0  ;;  %v950_v62 = vmax.f32 %v818_v47, 0.0  ;;  %v808_v63 = vrot.slane %v807_v48, 2  ;;  %v741_v0 = vmul.f32 %v2047_v16, %v369_v27 }
 0x12f   :  { %v989_v1 = vmul.f32 %v2043_v14, %v945_v53  ;;  %v838_v2 = vrot.slane %v837_v55, 1  ;;  %v802_v3 = vadd.f32 %v801_v56, %v800_v42  ;;  %v857_v5 = vrot.slane %v856_v57, 2 }
 0x130   :  { %v990_v6 = vmul.f32 %v2043_v14, %v946_v61  ;;  %v994_v7 = vmul.f32 %v2062_v37, %v950_v62  ;;  %v809_v8 = vadd.f32 %v808_v63, %v807_v48  ;;  %v758_v9 = vmul.f32 %v1398_v28, %v2049_v17  ;;  %v381_v10 = vpop.f32.mrb[12].mxu0  ;;  %v1404_v11 = vpop.f32.mrb[12].mxu1 }
 0x131   :  { %v839_v18 = vadd.f32 %v838_v2, %v837_v55  ;;  %v803_v19 = vrot.slane %v802_v3, 1  ;;  %v858_v20 = vadd.f32 %v857_v5, %v856_v57  ;;  %v742_v21 = vmul.f32 %v2039_v12, %v371_v33  ;;  %v383_v22 = vpop.f32.mrb[13].mxu0  ;;  %v566_v23 = vpop.f32.mrb[13].mxu1 }
 0x132   :  { %v1072_v25 = vrot.slane %v994_v7, 7  ;;  %v810_v26 = vrot.slane %v809_v8, 1  ;;  %v755_v27 = vmul.f32 %v2045_v15, %v546_v34  ;;  %v744_v14 = vmul.f32 %v2053_v24, %v375_v51 }
 0x133   :  { %v953_v29 = vmax.f32 %v839_v18, 0.0  ;;  %v804_v30 = vadd.f32 %v803_v19, %v802_v3  ;;  %v859_v4 = vrot.slane %v858_v20, 1  ;;  %v764_v28 = vmul.f32 %v1401_v52, %v2049_v17 }
 0x134   :  { %v1073_v31 = vsel %vm1038_vm2, %v1072_v25, %v991_v45  ;;  %v811_v32 = vadd.f32 %v810_v26, %v809_v8  ;;  %v875_v35 = vadd.f32 %v758_v9, %v755_v27  ;;  %v819_v36 = vadd.f32 %v744_v14, %v741_v0  ;;  %v387_v33 = vpop.f32.mrb[14].mxu0  ;;  %v1407_v39 = vpop.f32.mrb[14].mxu1 }
 0x135   :  { %v997_v40 = vmul.f32 %v2065_v38, %v953_v29  ;;  %v948_v41 = vmax.f32 %v804_v30, 0.0  ;;  %v860_v42 = vadd.f32 %v859_v4, %v858_v20  ;;  %v745_v34 = vmul.f32 %v2041_v13, %v377_v59  ;;  %v389_v43 = vpop.f32.mrb[15].mxu0  ;;  %v576_v46 = vpop.f32.mrb[15].mxu1 }
 0x136   :  { %v949_v47 = vmax.f32 %v811_v32, 0.0  ;;  %v876_v48 = vrot.slane %v875_v35, 4  ;;  %v820_v51 = vrot.slane %v819_v36, 4  ;;  %v761_v52 = vmul.f32 %v2045_v15, %v556_v60 }
 0x137   :  { %v1074_v53 = vrot.slane %v997_v40, 6  ;;  %v992_v45 = vmul.f32 %v2062_v37, %v948_v41  ;;  %v956_v55 = vmax.f32 %v860_v42, 0.0  ;;  %v826_v56 = vadd.f32 %v745_v34, %v742_v21 }
 0x138   :  { %v993_v57 = vmul.f32 %v2062_v37, %v949_v47  ;;  %v877_v61 = vadd.f32 %v876_v48, %v875_v35  ;;  %v821_v62 = vadd.f32 %v820_v51, %v819_v36  ;;  %v896_v63 = vadd.f32 %v764_v28, %v761_v52  ;;  %v2106_v0 = vpop.f32.mrb[16].mxu0 }
 0x139   :  { %v1075_v59 = vsel %vm1041_vm3, %v1074_v53, %v1073_v31  ;;  %v1037_v2 = vrot.slane %v992_v45, 7  ;;  %v1000_v3 = vmul.f32 %v2068_v44, %v956_v55  ;;  %v827_v5 = vrot.slane %v826_v56, 4  ;;  %v2110_v7 = vpop.f32.mrb[17].mxu0 }
 0x13a   :  { %v1058_v60 = vrot.slane %v993_v57, 7  ;;  %v878_v8 = vrot.slane %v877_v61, 2  ;;  %v822_v9 = vrot.slane %v821_v62, 2  ;;  %v897_v18 = vrot.slane %v896_v63, 4 }
 0x13b   :  { %v1039_v19 = vsel %vm1038_vm2, %v1037_v2, %v989_v1  ;;  %v1076_v37 = vrot.slane %v1000_v3, 5  ;;  %v828_v20 = vadd.f32 %v827_v5, %v826_v56  ;;  %v747_v21 = vmul.f32 %v2047_v16, %v381_v10 }
 0x13c   :  { %v2115_v25 = vsel %vm1038_vm2, %v1058_v60, %v990_v6  ;;  %v879_v26 = vadd.f32 %v878_v8, %v877_v61  ;;  %v823_v27 = vadd.f32 %v822_v9, %v821_v62  ;;  %v898_v14 = vadd.f32 %v897_v18, %v896_v63  ;;  %v2117_v29 = vpop.f32.mrb[18].mxu0 }
 0x13d   :  { %v1077_v30 = vsel %vm1044_vm4, %v1076_v37, %v1075_v59  ;;  %v829_v4 = vrot.slane %v828_v20, 2  ;;  %v770_v28 = vmul.f32 %v1404_v11, %v2049_v17  ;;  %v748_v1 = vmul.f32 %v2039_v12, %v383_v22  ;;  %v2122_v31 = vpop.f32.mrb[19].mxu0 }
 0x13e   :  { %v880_v32 = vrot.slane %v879_v26, 1  ;;  %v824_v10 = vrot.slane %v823_v27, 1  ;;  %v899_v35 = vrot.slane %v898_v14, 2  ;;  %v767_v6 = vmul.f32 %v2045_v15, %v566_v23 }
 0x13f   :  { %v830_v36 = vadd.f32 %v829_v4, %v828_v20  ;;  %v750_v40 = vmul.f32 %v2053_v24, %v387_v33  ;;  %v776_v41 = vmul.f32 %v1407_v39, %v2049_v17  ;;  %v751_v42 = vmul.f32 %v2041_v13, %v389_v43 }
 0x140   :  { %v881_v34 = vadd.f32 %v880_v32, %v879_v26  ;;  %v825_v47 = vadd.f32 %v824_v10, %v823_v27  ;;  %v900_v48 = vadd.f32 %v899_v35, %v898_v14  ;;  %v917_v11 = vadd.f32 %v770_v28, %v767_v6  ;;  %v405_v51 = vpop.f32.mrb[20].mxu0 }
 0x141   :  { %v831_v22 = vrot.slane %v830_v36, 1  ;;  %v840_v52 = vadd.f32 %v750_v40, %v747_v21  ;;  %v847_v53 = vadd.f32 %v751_v42, %v748_v1  ;;  %v773_v45 = vmul.f32 %v2045_v15, %v576_v46  ;;  %v407_v55 = vpop.f32.mrb[21].mxu0 }
 0x142   :  { %v959_v23 = vmax.f32 %v881_v34, 0.0  ;;  %v951_v56 = vmax.f32 %v825_v47, 0.0  ;;  %v901_v57 = vrot.slane %v900_v48, 1  ;;  %v918_v33 = vrot.slane %v917_v11, 4 }
 0x143   :  { %v832_v61 = vadd.f32 %v831_v22, %v830_v36  ;;  %v841_v17 = vrot.slane %v840_v52, 4  ;;  %v848_v39 = vrot.slane %v847_v53, 4  ;;  %v938_v43 = vadd.f32 %v776_v41, %v773_v45 }
 0x144   :  { %v1003_v62 = vmul.f32 %v2072_v49, %v959_v23  ;;  %v995_v63 = vmul.f32 %v2065_v38, %v951_v56  ;;  %v902_v59 = vadd.f32 %v901_v57, %v900_v48  ;;  %v919_v2 = vadd.f32 %v918_v33, %v917_v11  ;;  %v411_v3 = vpop.f32.mrb[22].mxu0 }
 0x145   :  { %v952_v5 = vmax.f32 %v832_v61, 0.0  ;;  %v842_v60 = vadd.f32 %v841_v17, %v840_v52  ;;  %v849_v8 = vadd.f32 %v848_v39, %v847_v53  ;;  %v939_v15 = vrot.slane %v938_v43, 4  ;;  %v413_v46 = vpop.f32.mrb[23].mxu0 }
 0x146   :  { %v1078_v9 = vrot.slane %v1003_v62, 4  ;;  %v1040_v18 = vrot.slane %v995_v63, 6  ;;  %v962_v37 = vmax.f32 %v902_v59, 0.0  ;;  %v920_v20 = vrot.slane %v919_v2, 2 }
 0x147   :  { %v996_v21 = vmul.f32 %v2065_v38, %v952_v5  ;;  %v843_v26 = vrot.slane %v842_v60, 2  ;;  %v850_v27 = vrot.slane %v849_v8, 2  ;;  %v940_v14 = vadd.f32 %v939_v15, %v938_v43 }
 0x148   :  { %v1079_v4 = vsel %vm1047_vm5, %v1078_v9, %v1077_v30  ;;  %v1042_v28 = vsel %vm1041_vm3, %v1040_v18, %v1039_v19  ;;  %v1006_v1 = vmul.f32 %v2075_v50, %v962_v37  ;;  %v921_v32 = vadd.f32 %v920_v20, %v919_v2  ;;  %v2135_v10 = vpop.f32.mrb[24].mxu0 }
 0x149   :  { %v1060_v35 = vrot.slane %v996_v21, 6  ;;  %v844_v6 = vadd.f32 %v843_v26, %v842_v60  ;;  %v851_v36 = vadd.f32 %v850_v27, %v849_v8  ;;  %v941_v40 = vrot.slane %v940_v14, 2  ;;  %v2137_v41 = vpop.f32.mrb[25].mxu0 }
 0x14a   :  { %v1080_v38 = vrot.slane %v1006_v1, 3  ;;  %v922_v42 = vrot.slane %v921_v32, 1  ;;  %v753_v34 = vmul.f32 %v2047_v16, %v2106_v0  ;;  %v754_v19 = vmul.f32 %v2039_v12, %v2110_v7 }
 0x14b   :  { %v1061_v30 = vsel %vm1041_vm3, %v1060_v35, %v2115_v25  ;;  %v845_v47 = vrot.slane %v844_v6, 1  ;;  %v852_v48 = vrot.slane %v851_v36, 1  ;;  %v942_v11 = vadd.f32 %v941_v40, %v940_v14 }
 0x14c   :  { %v1081_v22 = vsel %vm1050_vm6, %v1080_v38, %v1079_v4  ;;  %v923_v52 = vadd.f32 %v922_v42, %v921_v32  ;;  %v756_v53 = vmul.f32 %v2053_v24, %v2117_v29  ;;  %v757_v45 = vmul.f32 %v2041_v13, %v2122_v31  ;;  %v423_v0 = vpop.f32.mrb[26].mxu0 }
 0x14d   :  { %v846_v23 = vadd.f32 %v845_v47, %v844_v6  ;;  %v853_v56 = vadd.f32 %v852_v48, %v851_v36  ;;  %v943_v7 = vrot.slane %v942_v11, 1  ;;  %v759_v57 = vmul.f32 %v2047_v16, %v405_v51  ;;  %v425_v25 = vpop.f32.mrb[27].mxu0 }
 0x14e   :  { %v965_v33 = vmax.f32 %v923_v52, 0.0  ;;  %v861_v61 = vadd.f32 %v756_v53, %v753_v34  ;;  %v868_v17 = vadd.f32 %v757_v45, %v754_v19  ;;  %v760_v39 = vmul.f32 %v2039_v12, %v407_v55 }
 0x14f   :  { %v954_v43 = vmax.f32 %v846_v23, 0.0  ;;  %v955_v62 = vmax.f32 %v853_v56, 0.0  ;;  %v944_v63 = vadd.f32 %v943_v7, %v942_v11  ;;  %v762_v29 = vmul.f32 %v2053_v24, %v411_v3 }
 0x150   :  { %v1009_v59 = vmul.f32 %v2078_v54, %v965_v33  ;;  %v862_v31 = vrot.slane %v861_v61, 4  ;;  %v869_v2 = vrot.slane %v868_v17, 4  ;;  %v763_v5 = vmul.f32 %v2041_v13, %v413_v46  ;;  %v429_v60 = vpop.f32.mrb[28].mxu0 }
 0x151   :  { %v998_v51 = vmul.f32 %v2068_v44, %v954_v43  ;;  %v999_v8 = vmul.f32 %v2068_v44, %v955_v62  ;;  %v968_v15 = vmax.f32 %v944_v63, 0.0  ;;  %v882_v9 = vadd.f32 %v762_v29, %v759_v57  ;;  %v2157_v18 = vpop.f32.mrb[29].mxu0 }
 0x152   :  { %v1082_v55 = vrot.slane %v1009_v59, 2  ;;  %v863_v37 = vadd.f32 %v862_v31, %v861_v61  ;;  %v870_v20 = vadd.f32 %v869_v2, %v868_v17  ;;  %v889_v21 = vadd.f32 %v763_v5, %v760_v39 }
 0x153   :  { %v1043_v3 = vrot.slane %v998_v51, 5  ;;  %v1062_v26 = vrot.slane %v999_v8, 5  ;;  %v1012_v27 = vmul.f32 %v2083_v58, %v968_v15  ;;  %v883_v14 = vrot.slane %v882_v9, 4 }
 0x154   :  { %v1083_v46 = vsel %vm1053_vm7, %v1082_v55, %v1081_v22  ;;  %v864_v4 = vrot.slane %v863_v37, 2  ;;  %v871_v1 = vrot.slane %v870_v20, 2  ;;  %v890_v32 = vrot.slane %v889_v21, 4  ;;  %v435_v35 = vpop.f32.mrb[30].mxu0 }
 0x155   :  { %v1045_v44 = vsel %vm1044_vm4, %v1043_v3, %v1042_v28  ;;  %v1063_v6 = vsel %vm1044_vm4, %v1062_v26, %v1061_v30  ;;  %v1084_v36 = vrot.slane %v1012_v27, 1  ;;  %v884_v40 = vadd.f32 %v883_v14, %v882_v9  ;;  %v437_v38 = vpop.f32.mrb[31].mxu0 }
 0x156   :  { %v865_v42 = vadd.f32 %v864_v4, %v863_v37  ;;  %v872_v34 = vadd.f32 %v871_v1, %v870_v20  ;;  %v891_v19 = vadd.f32 %v890_v32, %v889_v21  ;;  %v765_v11 = vmul.f32 %v2047_v16, %v2135_v10 }
 0x157   :  { %v1085_v47 = vsel %vm1056_vm8, %v1084_v36, %v1083_v46  ;;  %v885_v48 = vrot.slane %v884_v40, 2  ;;  %v768_v22 = vmul.f32 %v2053_v24, %v423_v0  ;;  %v766_v30 = vmul.f32 %v2039_v12, %v2137_v41 }
 0x158   :  { %v866_v52 = vrot.slane %v865_v42, 1  ;;  %v873_v53 = vrot.slane %v872_v34, 1  ;;  %v892_v45 = vrot.slane %v891_v19, 2  ;;  %v769_v56 = vmul.f32 %v2041_v13, %v425_v25 }
 0x159   :  { %v886_v28 = vadd.f32 %v885_v48, %v884_v40  ;;  %v903_v23 = vadd.f32 %v768_v22, %v765_v11  ;;  %v771_v0 = vmul.f32 %v2047_v16, %v429_v60  ;;  %v774_v31 = vmul.f32 %v2053_v24, %v435_v35 }
 0x15a   :  { %v867_v7 = vadd.f32 %v866_v52, %v865_v42  ;;  %v874_v57 = vadd.f32 %v873_v53, %v872_v34  ;;  %v893_v33 = vadd.f32 %v892_v45, %v891_v19  ;;  %v910_v39 = vadd.f32 %v769_v56, %v766_v30 }
 0x15b   :  { %v887_v61 = vrot.slane %v886_v28, 1  ;;  %v904_v17 = vrot.slane %v903_v23, 4  ;;  %v924_v15 = vadd.f32 %v774_v31, %v771_v0  ;;  %v1101_v4 = vrot.slane %v1085_v47, 4 }
 0x15c   :  { %v957_v43 = vmax.f32 %v867_v7, 0.0  ;;  %v958_v10 = vmax.f32 %v874_v57, 0.0  ;;  %v894_v62 = vrot.slane %v893_v33, 1  ;;  %v911_v59 = vrot.slane %v910_v39, 4 }
 0x15d   :  { %v888_v63 = vadd.f32 %v887_v61, %v886_v28  ;;  %v905_v29 = vadd.f32 %v904_v17, %v903_v23  ;;  %v925_v21 = vrot.slane %v924_v15, 4  ;;  %v772_v32 = vmul.f32 %v2039_v12, %v2157_v18 }
 0x15e   :  { %v1001_v41 = vmul.f32 %v2072_v49, %v957_v43  ;;  %v1002_v25 = vmul.f32 %v2072_v49, %v958_v10  ;;  %v895_v2 = vadd.f32 %v894_v62, %v893_v33  ;;  %v912_v8 = vadd.f32 %v911_v59, %v910_v39 }
 0x15f   :  { %v960_v5 = vmax.f32 %v888_v63, 0.0  ;;  %v906_v51 = vrot.slane %v905_v29, 2  ;;  %v926_v46 = vadd.f32 %v925_v21, %v924_v15  ;;  %v775_v35 = vmul.f32 %v2041_v13, %v437_v38 }
 0x160   :  { %v1046_v9 = vrot.slane %v1001_v41, 4  ;;  %v1064_v55 = vrot.slane %v1002_v25, 4  ;;  %v961_v37 = vmax.f32 %v895_v2, 0.0  ;;  %v913_v60 = vrot.slane %v912_v8, 2 }
 0x161   :  { %v1004_v20 = vmul.f32 %v2075_v50, %v960_v5  ;;  %v907_v16 = vadd.f32 %v906_v51, %v905_v29  ;;  %v931_v34 = vadd.f32 %v775_v35, %v772_v32  ;;  %v1102_v11 = vadd.f32 %v1101_v4, %v1085_v47 }
 0x162   :  { %v1048_v3 = vsel %vm1047_vm5, %v1046_v9, %v1045_v44  ;;  %v1065_v24 = vsel %vm1047_vm5, %v1064_v55, %v1063_v6  ;;  %v1005_v26 = vmul.f32 %v2075_v50, %v961_v37  ;;  %v914_v14 = vadd.f32 %v913_v60, %v912_v8 }
 0x163   :  { %v1049_v49 = vrot.slane %v1004_v20, 3  ;;  %v908_v27 = vrot.slane %v907_v16, 1  ;;  %v927_v44 = vrot.slane %v926_v46, 2  ;;  %v932_v22 = vrot.slane %v931_v34, 4 }
 0x164   :  { %v1066_v1 = vrot.slane %v1005_v26, 3  ;;  %v915_v42 = vrot.slane %v914_v14, 1  ;;  %v1103_v28 = vrot.slane %v1102_v11, 2  ;;  %v1108_v25 = vstv %s2210_s4  ;;  %s1546_s4 = smov [#allocation3]  }
 0x165   :  { %v1051_v36 = vsel %vm1050_vm6, %v1049_v49, %v1048_v3  ;;  %v909_v40 = vadd.f32 %v908_v27, %v907_v16  ;;  %v928_v48 = vadd.f32 %v927_v44, %v926_v46  ;;  %v933_v12 = vadd.f32 %v932_v22, %v931_v34  ;;  %s1168_s8 = sshll.u32 %s1546_s4, 4  ;;  %s1169_s8 = int_to_ptr.vmem [resolvable:$true] %s1168_s8 }
 0x166   :  { %v1067_v6 = vsel %vm1050_vm6, %v1066_v1, %v1065_v24  ;;  %v916_v19 = vadd.f32 %v915_v42, %v914_v14  ;;  %v1104_v61 = vadd.f32 %v1103_v28, %v1102_v11  ;;  %v1137_v44 = vlaneseq  ;;  %s1520_s9 = scalar_lea.vmem %s1169_s8, 48  ;;  %s1524_s10 = scalar_lea.vmem %s1169_s8, 64 }
 0x167   :  { %v963_v50 = vmax.f32 %v909_v40, 0.0  ;;  %v929_v45 = vrot.slane %v928_v48, 1  ;;  %v934_v30 = vrot.slane %v933_v12, 2  ;;  %v1545_v40 = vmov 1966171168   ;;  %p1521_p0 = scmp.ne.s32.totalorder %s1169_s8, %s1520_s9  ;;  %p1525_p1 = scmp.lt.s32.totalorder %s1169_s8, %s1169_s8 }
 0x168   :  { %v964_v53 = vmax.f32 %v916_v19, 0.0  ;;  %v1105_v62 = vrot.slane %v1104_v61, 1  ;;  %v1135_v42 = vunpack.c.l.s4 %v1545_v40  ;;  %v1138_v34 = vshrl.u32 %v1137_v44, 7  ;;  %p1526_p2 = scmp.lt.s32.totalorder %s1524_s10, %s1520_s9 }
 0x169   :  { %v1007_v52 = vmul.f32 %v2078_v54, %v963_v50  ;;  %v930_v38 = vadd.f32 %v929_v45, %v928_v48  ;;  %v935_v57 = vadd.f32 %v934_v30, %v933_v12  ;;  %vm1159_vm9 = vcmp.lt.s32.totalorder %v1137_v44, 384 }
 0x16a   :  { %v1008_v13 = vmul.f32 %v2078_v54, %v964_v53  ;;  %v1106_v59 = vadd.f32 %v1105_v62, %v1104_v61  ;;  %p1527_p3 = por %p1526_p2, %p1525_p1 }
 0x16b   :  { %v1052_v18 = vrot.slane %v1007_v52, 2  ;;  %v966_v7 = vmax.f32 %v930_v38, 0.0  ;;  %v936_v17 = vrot.slane %v935_v57, 1 }
 0x16c   :  { %v1068_v56 = vrot.slane %v1008_v13, 2  ;;  %v1111_v8 = vadd.f32 %v1108_v25, %v1106_v59  ;;  %p1528_p4 = pnand %p1527_p3, %p1521_p0 }
 0x16d   :  { %v1054_v23 = vsel %vm1053_vm7, %v1052_v18, %v1051_v36  ;;  %v1010_v47 = vmul.f32 %v2083_v58, %v966_v7  ;;  %v937_v43 = vadd.f32 %v936_v17, %v935_v57 }
 0x16e   :  { %v1069_v33 = vsel %vm1053_vm7, %v1068_v56, %v1067_v6  ;;  %v1114_v16 = vsub.f32 0.0, %v1111_v8  ;;  %v1136_v6 = vunpack.c.0.s8 %v1135_v42 }
 0x16f   :  { %v1055_v39 = vrot.slane %v1010_v47, 1  ;;  %v967_v0 = vmax.f32 %v937_v43, 0.0 }
 0x170   :  { %v1119_v24 = vmul.f32 1.442695, %v1114_v16  ;;  %v1139_v48 = vsub.s32 %v1136_v6, %v1138_v34 }
 0x171   :  { %v1057_v10 = vsel %vm1056_vm8, %v1055_v39, %v1054_v23  ;;  %v1011_v29 = vmul.f32 %v2083_v58, %v967_v0 }
 0x172   :  { %v1089_v54 = vrot.slane %v1057_v10, 4 }
 0x173   :  { %v1070_v41 = vrot.slane %v1011_v29, 1 }
 0x174   :  { %v1090_v63 = vadd.f32 %v1089_v54, %v1057_v10 }
 0x175   :  { %v1071_v5 = vsel %vm1056_vm8, %v1070_v41, %v1069_v33 }
 0x176   :  { %v1091_v31 = vrot.slane %v1090_v63, 2  ;;  %v1095_v51 = vrot.slane %v1071_v5, 4 }
 0x178   :  { %v1092_v2 = vadd.f32 %v1091_v31, %v1090_v63  ;;  %v1096_v9 = vadd.f32 %v1095_v51, %v1071_v5 }
 0x17a   :  { %v1093_v15 = vrot.slane %v1092_v2, 1  ;;  %v1097_v37 = vrot.slane %v1096_v9, 2 }
 0x17c   :  { %v1094_v55 = vadd.f32 %v1093_v15, %v1092_v2  ;;  %v1098_v60 = vadd.f32 %v1097_v37, %v1096_v9 }
 0x17e   :  { %v1109_v20 = vadd.f32 %v1108_v25, %v1094_v55  ;;  %v1099_v21 = vrot.slane %v1098_v60, 1 }
 0x180   :  { %v1112_v58 = vsub.f32 0.0, %v1109_v20  ;;  %v1100_v26 = vadd.f32 %v1099_v21, %v1098_v60 }
 0x182   :  { %v1115_v3 = vmul.f32 1.442695, %v1112_v58  ;;  %v1110_v49 = vadd.f32 %v1108_v25, %v1100_v26 }
 0x184   :  { %1508 = vpow2.f32 %v1115_v3  ;;  %v1113_v27 = vsub.f32 0.0, %v1110_v49 }
 0x185   :  { %1510 = vpow2.f32 %v1119_v24 }
 0x186   :  { %v1117_v14 = vmul.f32 1.442695, %v1113_v27 }
 0x188   :  { %1512 = vpow2.f32 %v1117_v14 }
 0x18e   :  { %v1509_v46 = vpop.eup %1508 }
 0x18f   :  { %v1511_v4 = vpop.eup %1510  ;;  %v1121_v1 = vadd.f32 1.0, %v1509_v46 }
 0x190   :  { %v1123_v32 = vadd.f32 1.0, %v1511_v4 }
 0x191   :  { %1514 = vrcp.f32 %v1121_v1 }
 0x192   :  { %v1513_v35 = vpop.eup %1512  ;;  %1516 = vrcp.f32 %v1123_v32 }
 0x193   :  { %v1122_v36 = vadd.f32 1.0, %v1513_v35 }
 0x195   :  { %1518 = vrcp.f32 %v1122_v36 }
 0x19b   :  { %v1515_v50 = vpop.eup %1514 }
 0x19c   :  { %v1517_v19 = vpop.eup %1516 }
 0x19d   :  { %v1147_v53 = vrot.slane %v1517_v19, %v1139_v48 }
 0x19f   :  { %v1519_v11 = vpop.eup %1518 }
 0x1a0   :  { %v1133_v22 = vcombine.low %v1515_v50, %v1519_v11 }
 0x1a2   :  { %v1140_v52 = vrot.slane %v1133_v22, %v1139_v48 }
 0x1a4   :  { %v1148_v45 = vcombine.low %v1140_v52, %v1147_v53 }
 0x1a6   :  { %v1155_v12 = vrot.slane %v1148_v45, %v1139_v48 }
 0x1a8   :  { %1161 = vst.msk [vmem:[#allocation3] sm:$0x7] %vm1159_vm9, %v1155_v12 }
 0x1a9   :  { %1531 = shalt.err (!%p1528_p4)
}
 0x1aa   :  { %s1532_s12 = scalar_lea.hbm %s2211_s5, 48 }
 0x1ab   :  { %p1533_p5 = scmp.ne.s32.totalorder %s2211_s5, %s1532_s12  ;;  %p1536_p6 = scmp.lt.u32.totalorder %s1532_s12, %s2211_s5 }
 0x1ad   :  { %p1538_p7 = pnand %p1536_p6, %p1533_p5 }
 0x1af   :  { %1541 = shalt.err (!%p1538_p7)
}
 0x1b0   :  { %1171 = dma.vmem_to_hbm [thread:$0]  %s1169_s8, 48, %s2211_s5, [#allocation4]  }
 0x1b1   :  { %1542 = dma.done.wait [#allocation4], 48  }
 0x1b2   :  { %1543 = vsyncadd [#allocation4], 4294967248 }
 0x1b3   :  { %1175 = vsyncpa [#allocation4], 1 }

</bundles_post_ra>
